<compile_context>
chip_gen: v6e
topology: v6e:2x2x1
jax: 0.10.0
libtpu: 0.0.40
codegen_flags: <defaults>
</compile_context>

<pallas_src>
import functools

import jax
import jax.numpy as jnp
from jax.experimental import pallas as pl
from jax.experimental.pallas import tpu as pltpu


# ----------------------------------------------------------------------------
# Pallas kernels: (optional fused input fake-quant) -> bf16 MXU matmul -> bias -> act
# ----------------------------------------------------------------------------
def _mm_kernel(x_ref, w_ref, b_ref, o_ref, *, activation):
    x = x_ref[...].astype(jnp.bfloat16)
    acc = jnp.dot(x, w_ref[...], preferred_element_type=jnp.float32)
    acc = acc + b_ref[...]
    if activation == "relu":
        acc = jnp.maximum(acc, 0.0)
    o_ref[...] = acc


def _mm_fq_kernel(qp_ref, x_ref, w_ref, b_ref, o_ref, *, activation):
    # Fused fake-quant (quant-dequant) of the input tile.
    # qp = (scale, zero_point, clip_lo, clip_hi, 1/scale, 0, 0, 0)
    qp = qp_ref[...]
    scale, zp, lo, hi, inv = qp[0, 0], qp[0, 1], qp[0, 2], qp[0, 3], qp[0, 4]
    x = x_ref[...]
    x = (jnp.clip(jnp.round(scale * x - zp), lo, hi) + zp) * inv
    acc = jnp.dot(x.astype(jnp.bfloat16), w_ref[...],
                  preferred_element_type=jnp.float32)
    acc = acc + b_ref[...]
    if activation == "relu":
        acc = jnp.maximum(acc, 0.0)
    o_ref[...] = acc


def _round_up(a, b):
    return ((a + b - 1) // b) * b


def matmul_bias_act(x2d, w2d, bias, activation=None, qparams=None, tm=256):
    """out = act(fake_quant(x2d) @ w2d + bias); bf16 MXU operands, f32 accumulation.

    x2d: (M, K), w2d: (K, N), bias: (N,), qparams: optional (1, 8) f32 fake-quant
    params applied to the x tile inside the kernel prologue.
    """
    M, K = x2d.shape
    Kw, N = w2d.shape
    assert K == Kw, (K, Kw)

    # Tile selection: large tiles (amortize ~0.35us/step), >=2 grid steps when
    # possible (v7x has 2 TensorCores), bounded by a VMEM budget safe on all gens.
    tm_eff = min(tm, _round_up(-(-M // 2), 16))
    tm_eff = max(16, _round_up(tm_eff, 16))
    x_bytes = 4 if qparams is not None else 2
    budget = 24 * 1024 * 1024          # headroom under v7x 32 MiB scoped default
    while tm_eff > 16 and (2 * tm_eff * K * x_bytes + 2 * K * N * 2
                           + 2 * tm_eff * N * 4) > budget:
        tm_eff = max(16, _round_up(tm_eff // 2, 16))
    Mp = _round_up(M, tm_eff)
    if Mp != M:
        x2d = jnp.pad(x2d, ((0, Mp - M), (0, 0)))

    # TODO(synk): for production widths (N > 128) add a parallel N grid axis instead
    # of keeping the whole (K, N) weight / (tm, N) output in one block.
    xin = x2d.astype(jnp.float32 if qparams is not None else jnp.bfloat16)
    w = w2d.astype(jnp.bfloat16)
    b2d = bias.reshape(1, N).astype(jnp.float32)

    x_spec = pl.BlockSpec((tm_eff, K), lambda i: (i, 0))
    w_spec = pl.BlockSpec((K, N), lambda i: (0, 0))
    b_spec = pl.BlockSpec((1, N), lambda i: (0, 0))
    o_spec = pl.BlockSpec((tm_eff, N), lambda i: (i, 0))

    if qparams is None:
        kernel = functools.partial(_mm_kernel, activation=activation)
        in_specs = [x_spec, w_spec, b_spec]
        args = (xin, w, b2d)
    else:
        kernel = functools.partial(_mm_fq_kernel, activation=activation)
        qp_spec = pl.BlockSpec((1, 8), lambda i: (0, 0))
        in_specs = [qp_spec, x_spec, w_spec, b_spec]
        args = (qparams, xin, w, b2d)

    out = pl.pallas_call(
        kernel,
        out_shape=jax.ShapeDtypeStruct((Mp, N), jnp.float32),
        grid_spec=pltpu.PrefetchScalarGridSpec(
            num_scalar_prefetch=0,
            grid=(Mp // tm_eff,),
            in_specs=in_specs,
            out_specs=o_spec,
        ),
        compiler_params=pltpu.CompilerParams(dimension_semantics=("parallel",)),
    )(*args)
    return out[:M] if Mp != M else out


# ----------------------------------------------------------------------------
# Fake-quant parameter packing / XLA-side application (tiny, fuses into consumers)
# ----------------------------------------------------------------------------
def _pack_qparams(scale, zp, lo, hi):
    vals = [scale, zp, lo, hi, 1.0 / scale, 0.0, 0.0, 0.0]
    return jnp.stack([jnp.asarray(v, jnp.float32) for v in vals]).reshape(1, 8)


def asym_qparams(x, bits):
    n = float(2 ** bits - 1)
    half = float(2 ** (bits - 1))
    x_min = jnp.min(x)
    x_max = jnp.max(x)
    scale = n / jnp.maximum(x_max - x_min, 1e-8)
    zp = jnp.round(scale * x_min) + half
    return _pack_qparams(scale, zp, -half, half - 1.0)


def sym_qparams(x, bits):
    n = float(2 ** (bits - 1) - 1)
    sat = jnp.maximum(jnp.maximum(jnp.abs(jnp.min(x)), jnp.abs(jnp.max(x))), 1e-8)
    scale = n / sat
    return _pack_qparams(scale, 0.0, -n - 1.0, n)


def apply_fq(x, qp):
    scale, zp, lo, hi, inv = qp[0, 0], qp[0, 1], qp[0, 2], qp[0, 3], qp[0, 4]
    return (jnp.clip(jnp.round(scale * x - zp), lo, hi) + zp) * inv


# ----------------------------------------------------------------------------
# Plain-JAX parameter prep (tiny tensors; no kernel launches)
# ----------------------------------------------------------------------------
def bn_fold(w_oihw, conv_bias, gamma, beta, mean, var, eps=1e-5):
    std = jnp.sqrt(var + eps)
    sf = gamma / std
    w_scaled = w_oihw * sf[:, None, None, None]
    b = conv_bias if conv_bias is not None else jnp.zeros_like(mean)
    b_scaled = (b - mean) * sf + beta
    return w_scaled, b_scaled


def sym_fakequant_weight(w, bits):
    # Per-tensor symmetric weight fake-quant (SymmetricQuantFunction, per_channel=False).
    n = float(2 ** (bits - 1) - 1)
    sat = jnp.maximum(jnp.maximum(jnp.abs(jnp.min(w)), jnp.abs(jnp.max(w))), 1e-8)
    scale = n / sat
    return jnp.clip(jnp.round(w * scale), -n - 1.0, n) / scale


# ----------------------------------------------------------------------------
# Scale-branch spatial sum + gather-free deformable sampling (XLA vector work)
# ----------------------------------------------------------------------------
def shift_sum_3x3(taps_bhw9):
    """conv_out[h,w] = sum_k taps[h+kh-1, w+kw-1, k] with zero padding (k = kh*3+kw)."""
    B, H, W, _ = taps_bhw9.shape
    tp = jnp.pad(taps_bhw9, ((0, 0), (1, 1), (1, 1), (0, 0)))
    out = jnp.zeros((B, H, W), jnp.float32)
    for kh in range(3):
        for kw in range(3):
            out = out + tp[:, kh:kh + H, kw:kw + W, kh * 3 + kw]
    return out


_TRI_WIN = {-1: (-2, -1, 0), 0: (0,), 1: (0, 1, 2)}


def deform_sample_shifts(x_nhwc, s_bhw1):
    """Deformable 3x3 bilinear sampling, position (h + dy*s, w + dx*s), s in [0,2].

    Separable shift+select weighted sum over a static +-2 window (no gather); zero
    padding outside the image (mmcv DCN semantics).  Returns (B*H*W, 9*C) im2col
    samples in (kh, kw, cin) column order.
    """
    B, H, W, C = x_nhwc.shape

    def tri(t):
        return jnp.maximum(0.0, 1.0 - jnp.abs(t))

    # Row pass: one bilinear-in-y intermediate per dy.
    xpad = jnp.pad(x_nhwc, ((0, 0), (2, 2), (0, 0), (0, 0)))
    rows = {}
    for dy in (-1, 0, 1):
        oy = dy * s_bhw1                                    # (B,H,W,1)
        r = jnp.zeros_like(x_nhwc)
        for d in _TRI_WIN[dy]:
            r = r + tri(oy - d) * xpad[:, 2 + d:2 + d + H, :, :]
        rows[dy] = r
    # Column pass: 9 tap samples in row-major (kh, kw) order.
    samples = []
    for dy in (-1, 0, 1):
        rpad = jnp.pad(rows[dy], ((0, 0), (0, 0), (2, 2), (0, 0)))
        for dx in (-1, 0, 1):
            ox = dx * s_bhw1
            v = jnp.zeros_like(x_nhwc)
            for d in _TRI_WIN[dx]:
                v = v + tri(ox - d) * rpad[:, :, 2 + d:2 + d + W, :]
            samples.append(v)
    cols = jnp.stack(samples, axis=3)                       # (B,H,W,9,C)
    return cols.reshape(B * H * W, 9 * C)


# ----------------------------------------------------------------------------
# QuantBaseNodeDeform forward (stride = 1)
# ----------------------------------------------------------------------------
def quant_base_node_deform_forward(x_nchw, params, weight_bit=8, act_bit=8):
    B, C, H, W = x_nchw.shape
    Ch = C // 2
    M = B * H * W

    x_nhwc = jnp.transpose(x_nchw, (0, 2, 3, 1)).astype(jnp.float32)   # NCHW -> NHWC
    x1 = x_nhwc[..., :Ch]                              # untouched branch (stride == 1)
    x2 = x_nhwc[..., Ch:]

    # ---- weight prep (BN fold + per-tensor symmetric fake-quant) in plain JAX
    w1, b1 = bn_fold(params["conv1_w"], None, *params["bn1"])
    w1_2d = sym_fakequant_weight(w1, weight_bit).reshape(Ch, Ch).T        # (Cin, Cout)

    wsq = sym_fakequant_weight(params["convs_w"], weight_bit)             # (1,Ch,3,3)
    ws_taps = jnp.transpose(wsq[0], (1, 2, 0)).reshape(9, Ch).T           # (Cin, 9)

    wd, bd = bn_fold(params["conv2_w"], None, *params["bn2"])
    wd_2d = jnp.transpose(sym_fakequant_weight(wd, weight_bit),
                          (2, 3, 1, 0)).reshape(9 * Ch, Ch)               # (9*Cin, Cout)

    w3, b3 = bn_fold(params["conv3_w"], None, *params["bn3"])
    w3_2d = sym_fakequant_weight(w3, weight_bit).reshape(Ch, Ch).T

    # ---- quant_convbn1 (1x1, BN-folded) + ReLU [Pallas]; asym quant_act1 params
    y1 = matmul_bias_act(x2.reshape(M, Ch), w1_2d, b1, activation="relu")
    qp1 = asym_qparams(y1, act_bit)

    # ---- quant_convbn2 scale branch: 3x3 conv (1 out-ch) as per-tap matmul [Pallas]
    #      with fused asym fake-quant of y1; spatial 3x3 sum + bias + Hardtanh(0,2)
    #      + asym fake-quant are tiny elementwise XLA ops.
    taps = matmul_bias_act(y1, ws_taps, jnp.zeros((9,), jnp.float32), qparams=qp1)
    s = shift_sum_3x3(taps.reshape(B, H, W, 9)) + params["convs_b"][0]
    s = jnp.clip(s, 0.0, 2.0)
    s = apply_fq(s, asym_qparams(s, act_bit))[..., None]                  # (B,H,W,1)

    # ---- deformable 3x3 conv: gather-free bilinear sampling (offsets = anchor*(s-1)),
    #      then BN-folded quantized matmul [Pallas]
    # TODO(synk): sampling itself stays in XLA (data-dependent per-pixel weights); a
    #             halo-BlockSpec Pallas version could fuse it with the matmul.
    y1q = apply_fq(y1, qp1).reshape(B, H, W, Ch)
    cols_d = deform_sample_shifts(y1q, s)
    y2 = matmul_bias_act(cols_d, wd_2d, bd)
    qp2 = sym_qparams(y2, act_bit)                    # quant_act2 (symmetric)

    # ---- quant_convbn3 (1x1, BN-folded) + ReLU [Pallas] with fused sym fake-quant of y2
    y3 = matmul_bias_act(y2, w3_2d, b3, activation="relu", qparams=qp2)
    y3q = apply_fq(y3, asym_qparams(y3, act_bit))     # shared quant_act (asymmetric)

    # ---- concat + channel_shuffle(groups=2), back to NCHW
    y_cat = jnp.concatenate([x1, y3q.reshape(B, H, W, Ch)], axis=-1)
    y_sh = (y_cat.reshape(B, H, W, 2, Ch)
            .transpose(0, 1, 2, 4, 3)
            .reshape(B, H, W, C))
    return jnp.transpose(y_sh, (0, 3, 1, 2))


# ----------------------------------------------------------------------------
# Demo
# ----------------------------------------------------------------------------
if __name__ == "__main__":
    B, C, H, W = 2, 16, 8, 8        # stride=1 BaseNode: channels split in half
    Ch = C // 2
    key = jax.random.PRNGKey(0)
    ks = jax.random.split(key, 10)

    def bn_params(k):
        k1, k2, k3, k4 = jax.random.split(k, 4)
        gamma = jax.random.uniform(k1, (Ch,), jnp.float32, 0.5, 1.5)
        beta = 0.1 * jax.random.normal(k2, (Ch,), jnp.float32)
        mean = 0.1 * jax.random.normal(k3, (Ch,), jnp.float32)
        var = jax.random.uniform(k4, (Ch,), jnp.float32, 0.5, 1.5)
        return (gamma, beta, mean, var)

    x = jax.random.normal(ks[0], (B, C, H, W), jnp.float32)
    params = {
        "conv1_w": 0.1 * jax.random.normal(ks[1], (Ch, Ch, 1, 1), jnp.float32),
        "bn1": bn_params(ks[2]),
        "convs_w": 0.1 * jax.random.normal(ks[3], (1, Ch, 3, 3), jnp.float32),
        "convs_b": 0.1 * jax.random.normal(ks[4], (1,), jnp.float32),
        "conv2_w": 0.1 * jax.random.normal(ks[5], (Ch, Ch, 3, 3), jnp.float32),
        "bn2": bn_params(ks[6]),
        "conv3_w": 0.1 * jax.random.normal(ks[7], (Ch, Ch, 1, 1), jnp.float32),
        "bn3": bn_params(ks[8]),
    }

    fwd = jax.jit(lambda xx, pp: quant_base_node_deform_forward(xx, pp,
                                                                weight_bit=8,
                                                                act_bit=8))
    out = jax.block_until_ready(fwd(x, params))
    assert out.shape == (B, C, H, W) and out.dtype == jnp.float32
    assert bool(jnp.all(jnp.isfinite(out)))
    print("KERNEL_OK")
</pallas_src>

<mosaic_0001>
module attributes {stable_mosaic.version = 11 : i64} {
  func.func @_mm_kernel(%arg0: i32, %arg1: memref<64x8xbf16, #tpu.memory_space<vmem>>, %arg2: memref<8x8xbf16, #tpu.memory_space<vmem>>, %arg3: memref<1x8xf32, #tpu.memory_space<vmem>>, %arg4: memref<64x8xf32, #tpu.memory_space<vmem>>) attributes {dimension_semantics = [#tpu.dimension_semantics<parallel>], iteration_bounds = array<i64: 2>, scalar_prefetch = 0 : i64, scratch_operands = 0 : i64, tpu.core_type = #tpu.core_type<tc>, window_params = [{transform_indices = @transform_0, window_bounds = array<i64: 64, 8>}, {pipeline_mode = #tpu.pipeline_mode<synchronous>, transform_indices = @transform_1, window_bounds = array<i64: 8, 8>}, {pipeline_mode = #tpu.pipeline_mode<synchronous>, transform_indices = @transform_2, window_bounds = array<i64: 1, 8>}, {transform_indices = @transform_3, window_bounds = array<i64: 64, 8>}]} {
    %c0 = arith.constant 0 : index
    %c0_0 = arith.constant 0 : index
    %0 = vector.load %arg1[%c0, %c0_0] : memref<64x8xbf16, #tpu.memory_space<vmem>>, vector<64x8xbf16>
    %c0_1 = arith.constant 0 : index
    %c0_2 = arith.constant 0 : index
    %1 = vector.load %arg2[%c0_1, %c0_2] : memref<8x8xbf16, #tpu.memory_space<vmem>>, vector<8x8xbf16>
    %cst = arith.constant dense<0.000000e+00> : vector<64x8xf32>
    %2 = tpu.matmul %0, %1, %cst {dimension_numbers = #tpu.dot_dimension_numbers<[1], [0], [0], [1], [0, 0, 1, 1], [], []>} : vector<64x8xbf16>, vector<8x8xbf16>, vector<64x8xf32> -> vector<64x8xf32>
    %c0_3 = arith.constant 0 : index
    %c0_4 = arith.constant 0 : index
    %3 = vector.load %arg3[%c0_3, %c0_4] : memref<1x8xf32, #tpu.memory_space<vmem>>, vector<1x8xf32>
    %4 = vector.broadcast %3 : vector<1x8xf32> to vector<64x8xf32>
    %5 = arith.addf %2, %4 : vector<64x8xf32>
    %cst_5 = arith.constant 0.000000e+00 : f32
    %6 = vector.broadcast %cst_5 : f32 to vector<64x8xf32>
    %7 = arith.maximumf %5, %6 : vector<64x8xf32>
    %c0_6 = arith.constant 0 : index
    %c0_7 = arith.constant 0 : index
    %8 = vector.load %arg4[%c0_6, %c0_7] : memref<64x8xf32, #tpu.memory_space<vmem>>, vector<64x8xf32>
    tpu.vector_store %arg4[%c0_6, %c0_7], %7 {strides = array<i32>} : memref<64x8xf32, #tpu.memory_space<vmem>>, vector<64x8xf32>,
    return
  }
  func.func @transform_0(%arg0: i32) -> (i32, i32) {
    %c0_i32 = arith.constant 0 : i32
    %c0_i32_0 = arith.constant 0 : i32
    return %arg0, %c0_i32 : i32, i32
  }
  func.func @transform_1(%arg0: i32) -> (i32, i32) {
    %c0_i32 = arith.constant 0 : i32
    %c0_i32_0 = arith.constant 0 : i32
    %c0_i32_1 = arith.constant 0 : i32
    return %c0_i32, %c0_i32_0 : i32, i32
  }
  func.func @transform_2(%arg0: i32) -> (i32, i32) {
    %c0_i32 = arith.constant 0 : i32
    %c0_i32_0 = arith.constant 0 : i32
    %c0_i32_1 = arith.constant 0 : i32
    return %c0_i32, %c0_i32_0 : i32, i32
  }
  func.func @transform_3(%arg0: i32) -> (i32, i32) {
    %c0_i32 = arith.constant 0 : i32
    %c0_i32_0 = arith.constant 0 : i32
    return %arg0, %c0_i32 : i32, i32
  }
}

module attributes {stable_mosaic.version = 11 : i64} {
  func.func @_mm_fq_kernel(%arg0: i32, %arg1: memref<1x8xf32, #tpu.memory_space<vmem>>, %arg2: memref<64x8xf32, #tpu.memory_space<vmem>>, %arg3: memref<8x9xbf16, #tpu.memory_space<vmem>>, %arg4: memref<1x9xf32, #tpu.memory_space<vmem>>, %arg5: memref<64x9xf32, #tpu.memory_space<vmem>>) attributes {dimension_semantics = [#tpu.dimension_semantics<parallel>], iteration_bounds = array<i64: 2>, scalar_prefetch = 0 : i64, scratch_operands = 0 : i64, tpu.core_type = #tpu.core_type<tc>, window_params = [{pipeline_mode = #tpu.pipeline_mode<synchronous>, transform_indices = @transform_0, window_bounds = array<i64: 1, 8>}, {transform_indices = @transform_1, window_bounds = array<i64: 64, 8>}, {pipeline_mode = #tpu.pipeline_mode<synchronous>, transform_indices = @transform_2, window_bounds = array<i64: 8, 9>}, {pipeline_mode = #tpu.pipeline_mode<synchronous>, transform_indices = @transform_3, window_bounds = array<i64: 1, 9>}, {transform_indices = @transform_4, window_bounds = array<i64: 64, 9>}]} {
    %c0 = arith.constant 0 : index
    %c0_0 = arith.constant 0 : index
    %0 = vector.load %arg1[%c0, %c0_0] : memref<1x8xf32, #tpu.memory_space<vmem>>, vector<1x8xf32>
    %1 = vector.extract_strided_slice %0 {offsets = [0, 0], sizes = [1, 1], strides = [1, 1]} : vector<1x8xf32> to vector<1x1xf32>
    %2 = vector.extract %1[0, 0] : f32 from vector<1x1xf32>
    %3 = vector.extract_strided_slice %0 {offsets = [0, 1], sizes = [1, 1], strides = [1, 1]} : vector<1x8xf32> to vector<1x1xf32>
    %4 = vector.extract %3[0, 0] : f32 from vector<1x1xf32>
    %5 = vector.extract_strided_slice %0 {offsets = [0, 2], sizes = [1, 1], strides = [1, 1]} : vector<1x8xf32> to vector<1x1xf32>
    %6 = vector.extract %5[0, 0] : f32 from vector<1x1xf32>
    %7 = vector.extract_strided_slice %0 {offsets = [0, 3], sizes = [1, 1], strides = [1, 1]} : vector<1x8xf32> to vector<1x1xf32>
    %8 = vector.extract %7[0, 0] : f32 from vector<1x1xf32>
    %9 = vector.extract_strided_slice %0 {offsets = [0, 4], sizes = [1, 1], strides = [1, 1]} : vector<1x8xf32> to vector<1x1xf32>
    %10 = vector.extract %9[0, 0] : f32 from vector<1x1xf32>
    %c0_1 = arith.constant 0 : index
    %c0_2 = arith.constant 0 : index
    %11 = vector.load %arg2[%c0_1, %c0_2] : memref<64x8xf32, #tpu.memory_space<vmem>>, vector<64x8xf32>
    %12 = vector.broadcast %2 : f32 to vector<64x8xf32>
    %13 = arith.mulf %12, %11 : vector<64x8xf32>
    %14 = vector.broadcast %4 : f32 to vector<64x8xf32>
    %15 = arith.subf %13, %14 : vector<64x8xf32>
    %16 = math.roundeven %15 : vector<64x8xf32>
    %17 = vector.broadcast %6 : f32 to vector<64x8xf32>
    %18 = arith.maximumf %17, %16 : vector<64x8xf32>
    %19 = vector.broadcast %8 : f32 to vector<64x8xf32>
    %20 = arith.minimumf %19, %18 : vector<64x8xf32>
    %21 = vector.broadcast %4 : f32 to vector<64x8xf32>
    %22 = arith.addf %20, %21 : vector<64x8xf32>
    %23 = vector.broadcast %10 : f32 to vector<64x8xf32>
    %24 = arith.mulf %22, %23 : vector<64x8xf32>
    %25 = arith.truncf %24 : vector<64x8xf32> to vector<64x8xbf16>
    %c0_3 = arith.constant 0 : index
    %c0_4 = arith.constant 0 : index
    %26 = vector.load %arg3[%c0_3, %c0_4] : memref<8x9xbf16, #tpu.memory_space<vmem>>, vector<8x9xbf16>
    %cst = arith.constant dense<0.000000e+00> : vector<64x9xf32>
    %27 = tpu.matmul %25, %26, %cst {dimension_numbers = #tpu.dot_dimension_numbers<[1], [0], [0], [1], [0, 0, 1, 1], [], []>} : vector<64x8xbf16>, vector<8x9xbf16>, vector<64x9xf32> -> vector<64x9xf32>
    %c0_5 = arith.constant 0 : index
    %c0_6 = arith.constant 0 : index
    %28 = vector.load %arg4[%c0_5, %c0_6] : memref<1x9xf32, #tpu.memory_space<vmem>>, vector<1x9xf32>
    %29 = vector.broadcast %28 : vector<1x9xf32> to vector<64x9xf32>
    %30 = arith.addf %27, %29 : vector<64x9xf32>
    %c0_7 = arith.constant 0 : index
    %c0_8 = arith.constant 0 : index
    %31 = vector.load %arg5[%c0_7, %c0_8] : memref<64x9xf32, #tpu.memory_space<vmem>>, vector<64x9xf32>
    tpu.vector_store %arg5[%c0_7, %c0_8], %30 {strides = array<i32>} : memref<64x9xf32, #tpu.memory_space<vmem>>, vector<64x9xf32>,
    return
  }
  func.func @transform_0(%arg0: i32) -> (i32, i32) {
    %c0_i32 = arith.constant 0 : i32
    %c0_i32_0 = arith.constant 0 : i32
    %c0_i32_1 = arith.constant 0 : i32
    return %c0_i32, %c0_i32_0 : i32, i32
  }
  func.func @transform_1(%arg0: i32) -> (i32, i32) {
    %c0_i32 = arith.constant 0 : i32
    %c0_i32_0 = arith.constant 0 : i32
    return %arg0, %c0_i32 : i32, i32
  }
  func.func @transform_2(%arg0: i32) -> (i32, i32) {
    %c0_i32 = arith.constant 0 : i32
    %c0_i32_0 = arith.constant 0 : i32
    %c0_i32_1 = arith.constant 0 : i32
    return %c0_i32, %c0_i32_0 : i32, i32
  }
  func.func @transform_3(%arg0: i32) -> (i32, i32) {
    %c0_i32 = arith.constant 0 : i32
    %c0_i32_0 = arith.constant 0 : i32
    %c0_i32_1 = arith.constant 0 : i32
    return %c0_i32, %c0_i32_0 : i32, i32
  }
  func.func @transform_4(%arg0: i32) -> (i32, i32) {
    %c0_i32 = arith.constant 0 : i32
    %c0_i32_0 = arith.constant 0 : i32
    return %arg0, %c0_i32 : i32, i32
  }
}

module attributes {stable_mosaic.version = 11 : i64} {
  func.func @_mm_kernel(%arg0: i32, %arg1: memref<64x72xbf16, #tpu.memory_space<vmem>>, %arg2: memref<72x8xbf16, #tpu.memory_space<vmem>>, %arg3: memref<1x8xf32, #tpu.memory_space<vmem>>, %arg4: memref<64x8xf32, #tpu.memory_space<vmem>>) attributes {dimension_semantics = [#tpu.dimension_semantics<parallel>], iteration_bounds = array<i64: 2>, scalar_prefetch = 0 : i64, scratch_operands = 0 : i64, tpu.core_type = #tpu.core_type<tc>, window_params = [{transform_indices = @transform_0, window_bounds = array<i64: 64, 72>}, {pipeline_mode = #tpu.pipeline_mode<synchronous>, transform_indices = @transform_1, window_bounds = array<i64: 72, 8>}, {pipeline_mode = #tpu.pipeline_mode<synchronous>, transform_indices = @transform_2, window_bounds = array<i64: 1, 8>}, {transform_indices = @transform_3, window_bounds = array<i64: 64, 8>}]} {
    %c0 = arith.constant 0 : index
    %c0_0 = arith.constant 0 : index
    %0 = vector.load %arg1[%c0, %c0_0] : memref<64x72xbf16, #tpu.memory_space<vmem>>, vector<64x72xbf16>
    %c0_1 = arith.constant 0 : index
    %c0_2 = arith.constant 0 : index
    %1 = vector.load %arg2[%c0_1, %c0_2] : memref<72x8xbf16, #tpu.memory_space<vmem>>, vector<72x8xbf16>
    %cst = arith.constant dense<0.000000e+00> : vector<64x8xf32>
    %2 = tpu.matmul %0, %1, %cst {dimension_numbers = #tpu.dot_dimension_numbers<[1], [0], [0], [1], [0, 0, 1, 1], [], []>} : vector<64x72xbf16>, vector<72x8xbf16>, vector<64x8xf32> -> vector<64x8xf32>
    %c0_3 = arith.constant 0 : index
    %c0_4 = arith.constant 0 : index
    %3 = vector.load %arg3[%c0_3, %c0_4] : memref<1x8xf32, #tpu.memory_space<vmem>>, vector<1x8xf32>
    %4 = vector.broadcast %3 : vector<1x8xf32> to vector<64x8xf32>
    %5 = arith.addf %2, %4 : vector<64x8xf32>
    %c0_5 = arith.constant 0 : index
    %c0_6 = arith.constant 0 : index
    %6 = vector.load %arg4[%c0_5, %c0_6] : memref<64x8xf32, #tpu.memory_space<vmem>>, vector<64x8xf32>
    tpu.vector_store %arg4[%c0_5, %c0_6], %5 {strides = array<i32>} : memref<64x8xf32, #tpu.memory_space<vmem>>, vector<64x8xf32>,
    return
  }
  func.func @transform_0(%arg0: i32) -> (i32, i32) {
    %c0_i32 = arith.constant 0 : i32
    %c0_i32_0 = arith.constant 0 : i32
    return %arg0, %c0_i32 : i32, i32
  }
  func.func @transform_1(%arg0: i32) -> (i32, i32) {
    %c0_i32 = arith.constant 0 : i32
    %c0_i32_0 = arith.constant 0 : i32
    %c0_i32_1 = arith.constant 0 : i32
    return %c0_i32, %c0_i32_0 : i32, i32
  }
  func.func @transform_2(%arg0: i32) -> (i32, i32) {
    %c0_i32 = arith.constant 0 : i32
    %c0_i32_0 = arith.constant 0 : i32
    %c0_i32_1 = arith.constant 0 : i32
    return %c0_i32, %c0_i32_0 : i32, i32
  }
  func.func @transform_3(%arg0: i32) -> (i32, i32) {
    %c0_i32 = arith.constant 0 : i32
    %c0_i32_0 = arith.constant 0 : i32
    return %arg0, %c0_i32 : i32, i32
  }
}

module attributes {stable_mosaic.version = 11 : i64} {
  func.func @_mm_fq_kernel(%arg0: i32, %arg1: memref<1x8xf32, #tpu.memory_space<vmem>>, %arg2: memref<64x8xf32, #tpu.memory_space<vmem>>, %arg3: memref<8x8xbf16, #tpu.memory_space<vmem>>, %arg4: memref<1x8xf32, #tpu.memory_space<vmem>>, %arg5: memref<64x8xf32, #tpu.memory_space<vmem>>) attributes {dimension_semantics = [#tpu.dimension_semantics<parallel>], iteration_bounds = array<i64: 2>, scalar_prefetch = 0 : i64, scratch_operands = 0 : i64, tpu.core_type = #tpu.core_type<tc>, window_params = [{pipeline_mode = #tpu.pipeline_mode<synchronous>, transform_indices = @transform_0, window_bounds = array<i64: 1, 8>}, {transform_indices = @transform_1, window_bounds = array<i64: 64, 8>}, {pipeline_mode = #tpu.pipeline_mode<synchronous>, transform_indices = @transform_2, window_bounds = array<i64: 8, 8>}, {pipeline_mode = #tpu.pipeline_mode<synchronous>, transform_indices = @transform_3, window_bounds = array<i64: 1, 8>}, {transform_indices = @transform_4, window_bounds = array<i64: 64, 8>}]} {
    %c0 = arith.constant 0 : index
    %c0_0 = arith.constant 0 : index
    %0 = vector.load %arg1[%c0, %c0_0] : memref<1x8xf32, #tpu.memory_space<vmem>>, vector<1x8xf32>
    %1 = vector.extract_strided_slice %0 {offsets = [0, 0], sizes = [1, 1], strides = [1, 1]} : vector<1x8xf32> to vector<1x1xf32>
    %2 = vector.extract %1[0, 0] : f32 from vector<1x1xf32>
    %3 = vector.extract_strided_slice %0 {offsets = [0, 1], sizes = [1, 1], strides = [1, 1]} : vector<1x8xf32> to vector<1x1xf32>
    %4 = vector.extract %3[0, 0] : f32 from vector<1x1xf32>
    %5 = vector.extract_strided_slice %0 {offsets = [0, 2], sizes = [1, 1], strides = [1, 1]} : vector<1x8xf32> to vector<1x1xf32>
    %6 = vector.extract %5[0, 0] : f32 from vector<1x1xf32>
    %7 = vector.extract_strided_slice %0 {offsets = [0, 3], sizes = [1, 1], strides = [1, 1]} : vector<1x8xf32> to vector<1x1xf32>
    %8 = vector.extract %7[0, 0] : f32 from vector<1x1xf32>
    %9 = vector.extract_strided_slice %0 {offsets = [0, 4], sizes = [1, 1], strides = [1, 1]} : vector<1x8xf32> to vector<1x1xf32>
    %10 = vector.extract %9[0, 0] : f32 from vector<1x1xf32>
    %c0_1 = arith.constant 0 : index
    %c0_2 = arith.constant 0 : index
    %11 = vector.load %arg2[%c0_1, %c0_2] : memref<64x8xf32, #tpu.memory_space<vmem>>, vector<64x8xf32>
    %12 = vector.broadcast %2 : f32 to vector<64x8xf32>
    %13 = arith.mulf %12, %11 : vector<64x8xf32>
    %14 = vector.broadcast %4 : f32 to vector<64x8xf32>
    %15 = arith.subf %13, %14 : vector<64x8xf32>
    %16 = math.roundeven %15 : vector<64x8xf32>
    %17 = vector.broadcast %6 : f32 to vector<64x8xf32>
    %18 = arith.maximumf %17, %16 : vector<64x8xf32>
    %19 = vector.broadcast %8 : f32 to vector<64x8xf32>
    %20 = arith.minimumf %19, %18 : vector<64x8xf32>
    %21 = vector.broadcast %4 : f32 to vector<64x8xf32>
    %22 = arith.addf %20, %21 : vector<64x8xf32>
    %23 = vector.broadcast %10 : f32 to vector<64x8xf32>
    %24 = arith.mulf %22, %23 : vector<64x8xf32>
    %25 = arith.truncf %24 : vector<64x8xf32> to vector<64x8xbf16>
    %c0_3 = arith.constant 0 : index
    %c0_4 = arith.constant 0 : index
    %26 = vector.load %arg3[%c0_3, %c0_4] : memref<8x8xbf16, #tpu.memory_space<vmem>>, vector<8x8xbf16>
    %cst = arith.constant dense<0.000000e+00> : vector<64x8xf32>
    %27 = tpu.matmul %25, %26, %cst {dimension_numbers = #tpu.dot_dimension_numbers<[1], [0], [0], [1], [0, 0, 1, 1], [], []>} : vector<64x8xbf16>, vector<8x8xbf16>, vector<64x8xf32> -> vector<64x8xf32>
    %c0_5 = arith.constant 0 : index
    %c0_6 = arith.constant 0 : index
    %28 = vector.load %arg4[%c0_5, %c0_6] : memref<1x8xf32, #tpu.memory_space<vmem>>, vector<1x8xf32>
    %29 = vector.broadcast %28 : vector<1x8xf32> to vector<64x8xf32>
    %30 = arith.addf %27, %29 : vector<64x8xf32>
    %cst_7 = arith.constant 0.000000e+00 : f32
    %31 = vector.broadcast %cst_7 : f32 to vector<64x8xf32>
    %32 = arith.maximumf %30, %31 : vector<64x8xf32>
    %c0_8 = arith.constant 0 : index
    %c0_9 = arith.constant 0 : index
    %33 = vector.load %arg5[%c0_8, %c0_9] : memref<64x8xf32, #tpu.memory_space<vmem>>, vector<64x8xf32>
    tpu.vector_store %arg5[%c0_8, %c0_9], %32 {strides = array<i32>} : memref<64x8xf32, #tpu.memory_space<vmem>>, vector<64x8xf32>,
    return
  }
  func.func @transform_0(%arg0: i32) -> (i32, i32) {
    %c0_i32 = arith.constant 0 : i32
    %c0_i32_0 = arith.constant 0 : i32
    %c0_i32_1 = arith.constant 0 : i32
    return %c0_i32, %c0_i32_0 : i32, i32
  }
  func.func @transform_1(%arg0: i32) -> (i32, i32) {
    %c0_i32 = arith.constant 0 : i32
    %c0_i32_0 = arith.constant 0 : i32
    return %arg0, %c0_i32 : i32, i32
  }
  func.func @transform_2(%arg0: i32) -> (i32, i32) {
    %c0_i32 = arith.constant 0 : i32
    %c0_i32_0 = arith.constant 0 : i32
    %c0_i32_1 = arith.constant 0 : i32
    return %c0_i32, %c0_i32_0 : i32, i32
  }
  func.func @transform_3(%arg0: i32) -> (i32, i32) {
    %c0_i32 = arith.constant 0 : i32
    %c0_i32_0 = arith.constant 0 : i32
    %c0_i32_1 = arith.constant 0 : i32
    return %c0_i32, %c0_i32_0 : i32, i32
  }
  func.func @transform_4(%arg0: i32) -> (i32, i32) {
    %c0_i32 = arith.constant 0 : i32
    %c0_i32_0 = arith.constant 0 : i32
    return %arg0, %c0_i32 : i32, i32
  }
}

</mosaic_0001>

<bundles_post_ra>
// kernel: _lambda_.4
= control target key start
LH: loop header
LB: loop body
LE: loop exit
PB: predicated region body
PF: predicated region fallthrough
CT: control target
= control target key end

     0   :  { %s444_s12 = smov 0   ;;  %s479_s0 = inlined_call_operand.vmem [shape: bf16[128,8], index: 0, kind: input, shape index: {}]   ;;  %s480_s1 = inlined_call_operand.vmem [shape: bf16[8,8], index: 1, kind: input, shape index: {}]   ;;  %s481_s2 = inlined_call_operand.vmem [shape: f32[1,8], index: 2, kind: input, shape index: {}]   ;;  %s482_s3 = inlined_call_operand.vmem [shape: f32[128,8], index: 3, kind: output, shape index: {}]  }
   0x1 LB: > { %s365_s13 = sadd.s32 4294967295, %s422_s12   ;;  %p369_p0 = scmp.ge.s32.totalorder %s422_s12, 1  ;;  %s422_s12 = sphi %s444_s12, %s13_s12  }
   0x2   : > { %p138_p1 = scmp.lt.s32.totalorder %s422_s12, 3 }
   0x4   : > { %p139_p2 = pnand %p369_p0, %p138_p1 }
   0x5   : > { %s370_s16 = sshll.u32 (!%p139_p2), %s365_s13, 3 }
   0x6   : > { %142 = sbr.rel (%p139_p2) target bundleno = 220 (0xdc), region = 32  ;;  %p163_p3 = scmp.lt.s32.totalorder (!%p139_p2), %s370_s16, 15 }
   0xb   : > { %v183_v0 = vld [vmem:[%s480_s1] sm:$0xf]  ;;  %vm224_vm0 = vcmask 1043456   ;;  %s484_s16 = smov (!%p163_p3, %s370_s16), 15  ;;  %vm211_vm1 = vcmask 64512  }
   0xc   : > { %402 = vmatprep.subr.msk.bf16.mxu0 %vm224_vm0, %v183_v0  ;;  %403 = vmatprep.subr.msk.bf16.mxu1 %vm224_vm0, %v183_v0  ;;  %v226_v1 = vsel %vm224_vm0, %v183_v0, 0  ;;  %s371_s17 = sshll.u32 %s484_s16, 2  ;;  %v374_v6 = vld [vmem:[%s481_s2] ss:$0 sm:$0xff]  ;;  %s373_s23 = sshll.u32 %s484_s16, 3 }
   0xd   : > { %391 = vmatpush3.bf16.msra.mxu0 %v226_v1  ;;  %401 = vmatpush3.bf16.msra.mxu1 %v226_v1  ;;  %s166_s20 = scalar_lea.vmem %s479_s0, %s371_s17  ;;  %s172_s26 = scalar_lea.vmem %s482_s3, %s373_s23 }
   0xe   : > { %v412_v2 = vld [vmem:[%s166_s20] sm:$0xff]   ;;  %v413_v3 = vld [vmem:[%s166_s20 + $0x10] sm:$0xff]   ;;  %v414_v4 = vld [vmem:[%s166_s20 + $0x8] sm:$0xff]  }
   0xf   : > { %392 = vmatprep.mubr.msk.bf16.mxu0 %vm211_vm1, %v412_v2  ;;  %396 = vmatprep.mubr.msk.bf16.mxu1 %vm211_vm1, %v413_v3  ;;  %v415_v5 = vld [vmem:[%s166_s20 + $0x18] sm:$0xff]  }
  0x10   : > { %393 = vmatmul.mubr.msk.bf16.vlgmr.msra.gmra.mxu0 %vm211_vm1, %v414_v4  ;;  %397 = vmatmul.mubr.msk.bf16.vlgmr.msra.gmra.mxu1 %vm211_vm1, %v415_v5 }
  0xd0   : > { %v394_v7 = vpop.f32.mrf.mxu0  ;;  %v398_v9 = vpop.f32.mrf.mxu1 }
  0xd1   : > { %v271_v8 = vadd.f32 %v394_v7, %v374_v6  ;;  %v287_v10 = vadd.f32 %v398_v9, %v374_v6 }
  0xd2   : > { %v262_v11 = vpop.f32.mrf.mxu0  ;;  %v278_v14 = vpop.f32.mrf.mxu1 }
  0xd3   : > { %v295_v12 = vmax.f32 %v271_v8, 0.0  ;;  %v263_v13 = vadd.f32 %v374_v6, %v262_v11  ;;  %v299_v15 = vmax.f32 %v287_v10, 0.0  ;;  %v279_v16 = vadd.f32 %v374_v6, %v278_v14 }
  0xd4   : > { %v395_v17 = vpop.f32.mrf.mxu0  ;;  %v399_v20 = vpop.f32.mrf.mxu1 }
  0xd5   : > { %303 = vst.msk [vmem:[%s172_s26 + $0x10] sm:$0xff] %vm211_vm1, %v295_v12  ;;  %v293_v18 = vmax.f32 %v263_v13, 0.0  ;;  %v274_v19 = vadd.f32 %v395_v17, %v374_v6  ;;  %307 = vst.msk [vmem:[%s172_s26 + $0x30] sm:$0xff] %vm211_vm1, %v299_v15  ;;  %v297_v21 = vmax.f32 %v279_v16, 0.0  ;;  %v290_v22 = vadd.f32 %v399_v20, %v374_v6 }
  0xd6   : > { %v265_v23 = vpop.f32.mrf.mxu0  ;;  %v281_v26 = vpop.f32.mrf.mxu1 }
  0xd7   : > { %301 = vst.msk [vmem:[%s172_s26] sm:$0xff] %vm211_vm1, %v293_v18  ;;  %v296_v24 = vmax.f32 %v274_v19, 0.0  ;;  %v266_v25 = vadd.f32 %v374_v6, %v265_v23  ;;  %305 = vst.msk [vmem:[%s172_s26 + $0x20] sm:$0xff] %vm211_vm1, %v297_v21  ;;  %v300_v27 = vmax.f32 %v290_v22, 0.0  ;;  %v282_v28 = vadd.f32 %v374_v6, %v281_v26 }
  0xd9   : > { %304 = vst.msk [vmem:[%s172_s26 + $0x18] sm:$0xff] %vm211_vm1, %v296_v24  ;;  %v294_v29 = vmax.f32 %v266_v25, 0.0  ;;  %308 = vst.msk [vmem:[%s172_s26 + $0x38] sm:$0xff] %vm211_vm1, %v300_v27  ;;  %v298_v30 = vmax.f32 %v282_v28, 0.0 }
  0xdb   : > { %302 = vst.msk [vmem:[%s172_s26 + $0x8] sm:$0xff] %vm211_vm1, %v294_v29  ;;  %306 = vst.msk [vmem:[%s172_s26 + $0x28] sm:$0xff] %vm211_vm1, %v298_v30 }
  0xdc PF: > { %s13_s12 = sadd.s32 1, %s422_s12  }
  0xdd   : > { %p10_p4 = scmp.ge.s32.totalorder %s13_s12, 4  }
  0xdf   :  { %12 = sbr.rel (!%p10_p4) target bundleno = 1 (0x1), region = 62 }

// kernel: _lambda_.5
= control target key start
LH: loop header
LB: loop body
LE: loop exit
PB: predicated region body
PF: predicated region fallthrough
CT: control target
= control target key end

     0   :  { %s602_s15 = smov 0   ;;  %s755_s0 = inlined_call_operand.vmem [shape: f32[1,8], index: 0, kind: input, shape index: {}]   ;;  %s756_s1 = inlined_call_operand.vmem [shape: f32[128,8], index: 1, kind: input, shape index: {}]   ;;  %s757_s2 = inlined_call_operand.vmem [shape: bf16[8,9], index: 2, kind: input, shape index: {}]   ;;  %s758_s3 = inlined_call_operand.vmem [shape: f32[1,9], index: 3, kind: input, shape index: {}]   ;;  %s759_s4 = inlined_call_operand.vmem [shape: f32[128,9], index: 4, kind: output, shape index: {}]  }
   0x1 LB: > { %s444_s16 = sadd.s32 4294967295, %s571_s15   ;;  %p448_p0 = scmp.ge.s32.totalorder %s571_s15, 1  ;;  %s571_s15 = sphi %s602_s15, %s14_s15  }
   0x2   : > { %p163_p1 = scmp.lt.s32.totalorder %s571_s15, 3 }
   0x4   : > { %p164_p2 = pnand %p448_p0, %p163_p1 }
   0x5   : > { %s573_s19 = smov (!%p164_p2), 127   ;;  %s574_s20 = smov (!%p164_p2), 125  }
   0x6   : > { %167 = sbr.rel (%p164_p2) target bundleno = 418 (0x1a2), region = 36  ;;  %s575_s21 = smov (!%p164_p2), 126  }
   0x7   : > { %s576_s22 = smov (!%p164_p2), 124   ;;  %s449_s25 = sshll.u32 (!%p164_p2), %s444_s16, 3 }
   0x8   : > { %p190_p3 = scmp.lt.s32.totalorder (!%p164_p2), %s449_s25, 15 }
   0xb   : > { %v202_v0 = vld [vmem:[%s755_s0] sm:$0x1]  ;;  %vm310_vm0 = vcmask 1043456   ;;  %s773_s25 = smov (!%p190_p3, %s449_s25), 15  ;;  %vm297_vm6 = vcmask 64512   ;;  %vm379_vm10 = vcmask 72704  }
   0xc   : > { %204 = vrot.lane.b32.xlu0 %v202_v0, %s573_s19  ;;  %479 = vpush %v202_v0  ;;  %210 = vrot.lane.b32.xlu1 %v202_v0, %s574_s20  ;;  %v289_v1 = vld [vmem:[%s757_s2] sm:$0xf]  ;;  %s450_s26 = sshll.u32 %s773_s25, 3 }
   0xd   : > { %477 = vmatprep.subr.msk.bf16.mxu0 %vm310_vm0, %v289_v1  ;;  %478 = vmatprep.subr.msk.bf16.mxu1 %vm310_vm0, %v289_v1  ;;  %v312_v2 = vsel %vm310_vm0, %v289_v1, 0  ;;  %s193_s29 = scalar_lea.vmem %s756_s1, %s450_s26  ;;  %s199_s13 = scalar_lea.vmem %s759_s4, %s450_s26 }
   0xe   : > { %466 = vmatpush3.bf16.msra.mxu0 %v312_v2  ;;  %476 = vmatpush3.bf16.msra.mxu1 %v312_v2  ;;  %v216_v7 = vld [vmem:[%s193_s29] sm:$0xff]  ;;  %v217_v8 = vld [vmem:[%s193_s29 + $0x8] sm:$0xff]  ;;  %v218_v9 = vld [vmem:[%s193_s29 + $0x10] sm:$0xff] }
   0xf   : > { %v220_v10 = vld [vmem:[%s193_s29 + $0x20] sm:$0xff]  ;;  %v219_v12 = vld [vmem:[%s193_s29 + $0x18] sm:$0xff]  ;;  %v221_v13 = vld [vmem:[%s193_s29 + $0x28] sm:$0xff] }
  0x10   : > { %207 = vrot.lane.b32.xlu0 %v202_v0, %s575_s21  ;;  %213 = vrot.lane.b32.xlu1 %v202_v0, %s576_s22  ;;  %v222_v14 = vld [vmem:[%s193_s29 + $0x30] sm:$0xff]  ;;  %v223_v15 = vld [vmem:[%s193_s29 + $0x38] sm:$0xff] }
  0x3d   : > { %s480_s30 = spop %479 }
  0x3e   : > { %v224_v11 = vstv %s480_s30 }
  0x3f   : > { %v225_v16 = vmul.f32 %v224_v11, %v216_v7  ;;  %v226_v17 = vmul.f32 %v224_v11, %v217_v8  ;;  %v229_v18 = vmul.f32 %v224_v11, %v220_v10  ;;  %v227_v19 = vmul.f32 %v224_v11, %v218_v9 }
  0x40   : > { %v228_v20 = vmul.f32 %v224_v11, %v219_v12  ;;  %v230_v21 = vmul.f32 %v224_v11, %v221_v13  ;;  %v231_v22 = vmul.f32 %v224_v11, %v222_v14  ;;  %v232_v23 = vmul.f32 %v224_v11, %v223_v15 }
  0x7e   : > { %v205_v3 = vpop.permute.xlu0 %204  ;;  %v211_v4 = vpop.permute.xlu1 %210 }
  0x7f   : > { %481 = vpush %v205_v3 }
  0x82   : > { %v208_v5 = vpop.permute.xlu0 %207  ;;  %v214_v6 = vpop.permute.xlu1 %213 }
  0x83   : > { %483 = vpush %v208_v5 }
  0x84   : > { %485 = vpush %v211_v4 }
  0x85   : > { %487 = vpush %v214_v6 }
  0xb0   : > { %s482_s5 = spop %481 }
  0xb1   : > { %v624_v24 = vstv %s482_s5 }
  0xb2   : > { %v234_v25 = vsub.f32 %v225_v16, %v624_v24  ;;  %v235_v26 = vsub.f32 %v226_v17, %v624_v24  ;;  %v238_v27 = vsub.f32 %v229_v18, %v624_v24  ;;  %v239_v28 = vsub.f32 %v230_v21, %v624_v24 }
  0xb3   : > { %v631_v29 = vsub.f32 %v227_v19, %v624_v24  ;;  %v634_v30 = vsub.f32 %v228_v20, %v624_v24  ;;  %v637_v31 = vsub.f32 %v231_v22, %v624_v24  ;;  %v640_v35 = vsub.f32 %v232_v23, %v624_v24 }
  0xb4   : > { %s484_s6 = spop %483  ;;  %v489_v32 = vand.u32 2147483647, %v234_v25  ;;  %v491_v33 = vcvt.f32.s32 %v234_v25  ;;  %v497_v34 = vand.u32 2147483647, %v235_v26  ;;  %v494_v37 = vand.u32 2147483648, %v234_v25 }
  0xb5   : > { %v642_v36 = vstv %s484_s6  ;;  %s486_s7 = spop %485  ;;  %v499_v38 = vcvt.f32.s32 %v235_v26  ;;  %v521_v39 = vand.u32 2147483647, %v238_v27  ;;  %v502_v43 = vand.u32 2147483648, %v235_v26 }
  0xb6   : > { %v644_v40 = vstv %s486_s7  ;;  %s488_s8 = spop %487  ;;  %vm646_vm1 = vcmp.lt.f32.partialorder %v489_v32, 8388608.0  ;;  %v492_v42 = vcvt.s32.f32 %v491_v33  ;;  %vm652_vm2 = vcmp.lt.f32.partialorder %v497_v34, 8388608.0 }
  0xb7   : > { %v650_v44 = vstv %s488_s8  ;;  %v500_v46 = vcvt.s32.f32 %v499_v38  ;;  %v523_v47 = vcvt.f32.s32 %v238_v27  ;;  %vm656_vm3 = vcmp.lt.f32.partialorder %v521_v39, 8388608.0 }
  0xb8   : > { %v493_v48 = vand.u32 2147483647, %v492_v42  ;;  %v529_v50 = vand.u32 2147483647, %v239_v28  ;;  %v531_v51 = vcvt.f32.s32 %v239_v28  ;;  %v526_v54 = vand.u32 2147483648, %v238_v27 }
  0xb9   : > { %v501_v52 = vand.u32 2147483647, %v500_v46  ;;  %v524_v53 = vcvt.s32.f32 %v523_v47  ;;  %v505_v55 = vand.u32 2147483647, %v631_v29  ;;  %v534_v58 = vand.u32 2147483648, %v239_v28 }
  0xba   : > { %v495_v56 = vor.u32 %v494_v37, %v493_v48  ;;  %v532_v57 = vcvt.s32.f32 %v531_v51  ;;  %v507_v59 = vcvt.f32.s32 %v631_v29  ;;  %vm662_vm4 = vcmp.lt.f32.partialorder %v529_v50, 8388608.0 }
  0xbb   : > { %v503_v60 = vor.u32 %v502_v43, %v501_v52  ;;  %v525_v61 = vand.u32 2147483647, %v524_v53  ;;  %vm666_vm5 = vcmp.lt.f32.partialorder %v505_v55, 8388608.0  ;;  %v513_v3 = vand.u32 2147483647, %v634_v30 }
  0xbc   : > { %v496_v0 = vsel %vm646_vm1, %v495_v56, %v234_v25  ;;  %v533_v1 = vand.u32 2147483647, %v532_v57  ;;  %v508_v2 = vcvt.s32.f32 %v507_v59  ;;  %v515_v7 = vcvt.f32.s32 %v634_v30 }
  0xbd   : > { %v504_v4 = vsel %vm652_vm2, %v503_v60, %v235_v26  ;;  %v251_v5 = vmax.f32 %v642_v36, %v496_v0  ;;  %v527_v6 = vor.u32 %v526_v54, %v525_v61  ;;  %v510_v11 = vand.u32 2147483648, %v631_v29 }
  0xbe   : > { %v252_v8 = vmax.f32 %v642_v36, %v504_v4  ;;  %v535_v9 = vor.u32 %v534_v58, %v533_v1  ;;  %v509_v10 = vand.u32 2147483647, %v508_v2  ;;  %vm682_vm7 = vcmp.lt.f32.partialorder %v513_v3, 8388608.0 }
  0xbf   : > { %v260_v12 = vmin.f32 %v644_v40, %v251_v5  ;;  %v528_v13 = vsel %vm656_vm3, %v527_v6, %v238_v27  ;;  %v516_v15 = vcvt.s32.f32 %v515_v7  ;;  %v518_v23 = vand.u32 2147483648, %v634_v30 }
  0xc0   : > { %v261_v16 = vmin.f32 %v644_v40, %v252_v8  ;;  %v536_v17 = vsel %vm662_vm4, %v535_v9, %v239_v28  ;;  %v255_v18 = vmax.f32 %v642_v36, %v528_v13  ;;  %v511_v19 = vor.u32 %v510_v11, %v509_v10 }
  0xc1   : > { %v268_v20 = vadd.f32 %v260_v12, %v624_v24  ;;  %v256_v21 = vmax.f32 %v642_v36, %v536_v17  ;;  %v517_v22 = vand.u32 2147483647, %v516_v15  ;;  %v539_v28 = vcvt.f32.s32 %v637_v31 }
  0xc2   : > { %v269_v25 = vadd.f32 %v261_v16, %v624_v24  ;;  %v264_v26 = vmin.f32 %v644_v40, %v255_v18  ;;  %v512_v27 = vsel %vm666_vm5, %v511_v19, %v631_v29  ;;  %v537_v41 = vand.u32 2147483647, %v637_v31 }
  0xc3   : > { %v277_v32 = vmul.f32 %v650_v44, %v268_v20  ;;  %v265_v33 = vmin.f32 %v644_v40, %v256_v21  ;;  %v519_v34 = vor.u32 %v518_v23, %v517_v22  ;;  %v253_v37 = vmax.f32 %v642_v36, %v512_v27 }
  0xc4   : > { %v278_v38 = vmul.f32 %v650_v44, %v269_v25  ;;  %v272_v39 = vadd.f32 %v264_v26, %v624_v24  ;;  %v540_v42 = vcvt.s32.f32 %v539_v28  ;;  %v542_v46 = vand.u32 2147483648, %v637_v31 }
  0xc5   : > { %v273_v43 = vadd.f32 %v265_v33, %v624_v24  ;;  %v520_v29 = vsel %vm682_vm7, %v519_v34, %v634_v30  ;;  %v262_v45 = vmin.f32 %v644_v40, %v253_v37  ;;  %v547_v53 = vcvt.f32.s32 %v640_v35 }
  0xc6   : > { %v285_v47 = vpack.c.bf16 %v278_v38, %v277_v32  ;;  %v281_v48 = vmul.f32 %v650_v44, %v272_v39  ;;  %v254_v49 = vmax.f32 %v642_v36, %v520_v29  ;;  %v541_v50 = vand.u32 2147483647, %v540_v42 }
  0xc7   : > { %v282_v51 = vmul.f32 %v650_v44, %v273_v43  ;;  %v270_v52 = vadd.f32 %v262_v45, %v624_v24  ;;  %vm538_vm8 = vcmp.lt.f32.partialorder %v537_v41, 8388608.0  ;;  %v548_v56 = vcvt.s32.f32 %v547_v53 }
  0xc8   : > { %467 = vmatprep.mubr.msk.bf16.mxu0 %vm297_vm6, %v285_v47  ;;  %v263_v30 = vmin.f32 %v644_v40, %v254_v49  ;;  %v543_v54 = vor.u32 %v542_v46, %v541_v50  ;;  %v545_v60 = vand.u32 2147483647, %v640_v35  ;;  %v550_v62 = vand.u32 2147483648, %v640_v35 }
  0xc9   : > { %v287_v55 = vpack.c.bf16 %v282_v51, %v281_v48  ;;  %v279_v58 = vmul.f32 %v650_v44, %v270_v52  ;;  %v549_v61 = vand.u32 2147483647, %v548_v56 }
  0xca   : > { %v271_v57 = vadd.f32 %v263_v30, %v624_v24  ;;  %v544_v59 = vsel %vm538_vm8, %v543_v54, %v637_v31  ;;  %vm546_vm9 = vcmp.lt.f32.partialorder %v545_v60, 8388608.0 }
  0xcb   : > { %471 = vmatprep.mubr.msk.bf16.mxu1 %vm297_vm6, %v287_v55  ;;  %v257_v63 = vmax.f32 %v642_v36, %v544_v59  ;;  %v551_v1 = vor.u32 %v550_v62, %v549_v61 }
  0xcc   : > { %v280_v0 = vmul.f32 %v650_v44, %v271_v57 }
  0xcd   : > { %v266_v2 = vmin.f32 %v644_v40, %v257_v63  ;;  %v552_v4 = vsel %vm546_vm9, %v551_v1, %v640_v35  ;;  %v453_v35 = vld [vmem:[%s758_s3] ss:$0 sm:$0xff] }
  0xce   : > { %v286_v3 = vpack.c.bf16 %v280_v0, %v279_v58  ;;  %v258_v31 = vmax.f32 %v642_v36, %v552_v4 }
  0xcf   : > { %v274_v5 = vadd.f32 %v266_v2, %v624_v24 }
  0xd0   : > { %468 = vmatmul.mubr.msk.bf16.vlgmr.msra.gmra.mxu0 %vm297_vm6, %v286_v3  ;;  %v267_v6 = vmin.f32 %v644_v40, %v258_v31 }
  0xd1   : > { %v283_v8 = vmul.f32 %v650_v44, %v274_v5 }
  0xd2   : > { %v275_v7 = vadd.f32 %v267_v6, %v624_v24 }
  0xd4   : > { %v284_v9 = vmul.f32 %v650_v44, %v275_v7 }
  0xd6   : > { %v288_v10 = vpack.c.bf16 %v284_v9, %v283_v8 }
  0xd8   : > { %472 = vmatmul.mubr.msk.bf16.vlgmr.msra.gmra.mxu1 %vm297_vm6, %v288_v10 }
 0x190   : > { %v469_v36 = vpop.f32.mrf.mxu0 }
 0x191   : > { %v357_v40 = vadd.f32 %v469_v36, %v453_v35 }
 0x192   : > { %v348_v24 = vpop.f32.mrf.mxu0 }
 0x193   : > { %382 = vst.msk [vmem:[%s199_s13 + $0x10] sm:$0xff] %vm379_vm10, %v357_v40  ;;  %v349_v11 = vadd.f32 %v453_v35, %v348_v24 }
 0x194   : > { %v470_v44 = vpop.f32.mrf.mxu0 }
 0x195   : > { %380 = vst.msk [vmem:[%s199_s13] sm:$0xff] %vm379_vm10, %v349_v11  ;;  %v360_v12 = vadd.f32 %v470_v44, %v453_v35 }
 0x196   : > { %v351_v13 = vpop.f32.mrf.mxu0 }
 0x197   : > { %383 = vst.msk [vmem:[%s199_s13 + $0x18] sm:$0xff] %vm379_vm10, %v360_v12  ;;  %v352_v14 = vadd.f32 %v453_v35, %v351_v13 }
 0x198   : > { %v473_v15 = vpop.f32.mrf.mxu1 }
 0x199   : > { %381 = vst.msk [vmem:[%s199_s13 + $0x8] sm:$0xff] %vm379_vm10, %v352_v14  ;;  %v373_v16 = vadd.f32 %v473_v15, %v453_v35 }
 0x19a   : > { %v364_v17 = vpop.f32.mrf.mxu1 }
 0x19b   : > { %386 = vst.msk [vmem:[%s199_s13 + $0x30] sm:$0xff] %vm379_vm10, %v373_v16  ;;  %v365_v18 = vadd.f32 %v453_v35, %v364_v17 }
 0x19c   : > { %v474_v19 = vpop.f32.mrf.mxu1 }
 0x19d   : > { %384 = vst.msk [vmem:[%s199_s13 + $0x20] sm:$0xff] %vm379_vm10, %v365_v18  ;;  %v376_v20 = vadd.f32 %v474_v19, %v453_v35 }
 0x19e   : > { %v367_v21 = vpop.f32.mrf.mxu1 }
 0x19f   : > { %387 = vst.msk [vmem:[%s199_s13 + $0x38] sm:$0xff] %vm379_vm10, %v376_v20  ;;  %v368_v22 = vadd.f32 %v453_v35, %v367_v21 }
 0x1a1   : > { %385 = vst.msk [vmem:[%s199_s13 + $0x28] sm:$0xff] %vm379_vm10, %v368_v22 }
 0x1a2 PF: > { %s14_s15 = sadd.s32 1, %s571_s15  }
 0x1a3   : > { %p11_p4 = scmp.ge.s32.totalorder %s14_s15, 4  }
 0x1a5   :  { %13 = sbr.rel (!%p11_p4) target bundleno = 1 (0x1), region = 66 }

// kernel: _lambda_.6
= control target key start
LH: loop header
LB: loop body
LE: loop exit
PB: predicated region body
PF: predicated region fallthrough
CT: control target
= control target key end

     0   :  { %s502_s12 = smov 0   ;;  %s553_s0 = inlined_call_operand.vmem [shape: bf16[128,72], index: 0, kind: input, shape index: {}]   ;;  %s554_s1 = inlined_call_operand.vmem [shape: bf16[72,8], index: 1, kind: input, shape index: {}]   ;;  %s555_s2 = inlined_call_operand.vmem [shape: f32[1,8], index: 2, kind: input, shape index: {}]   ;;  %s556_s3 = inlined_call_operand.vmem [shape: f32[128,8], index: 3, kind: output, shape index: {}]  }
   0x1 LB: > { %s393_s13 = sadd.s32 4294967295, %s480_s12   ;;  %p397_p0 = scmp.ge.s32.totalorder %s480_s12, 1  ;;  %s480_s12 = sphi %s502_s12, %s13_s12  }
   0x2   : > { %p138_p1 = scmp.lt.s32.totalorder %s480_s12, 3 }
   0x4   : > { %p139_p2 = pnand %p397_p0, %p138_p1 }
   0x5   : > { %s398_s18 = sshll.u32 (!%p139_p2), %s393_s13, 3 }
   0x6   : > { %142 = sbr.rel (%p139_p2) target bundleno = 234 (0xea), region = 32  ;;  %p163_p3 = scmp.lt.s32.totalorder (!%p139_p2), %s398_s18, 15 }
   0xb   : > { %v465_v0 = vld [vmem:[%s554_s1 + $0x20] ss:$0 sps:$4 sm:$0xff]   ;;  %vm259_vm0 = vcmask 1043456   ;;  %v466_v1 = vld [vmem:[%s554_s1 + $0x18] sm:$0xff]   ;;  %v467_v3 = vld [vmem:[%s554_s1 + $0x10] sm:$0xff]   ;;  %s558_s18 = smov (!%p163_p3, %s398_s18), 15 }
   0xc   : > { %455 = vmatprep.subr.msk.bf16.mxu0 %vm259_vm0, %v465_v0  ;;  %456 = vmatprep.subr.msk.bf16.mxu1 %vm259_vm0, %v465_v0  ;;  %v261_v2 = vsel %vm259_vm0, %v465_v0, 0  ;;  %v468_v4 = vld [vmem:[%s554_s1 + $0x8] sm:$0xff]   ;;  %s399_s23 = sshll.u32 %s558_s18, 2  ;;  %vm246_vm1 = vcmask 588800   ;;  %v469_v7 = vld [vmem:[%s554_s1] sm:$0xff]   ;;  %s401_s29 = sshll.u32 %s558_s18, 3 }
   0xd   : > { %428 = vmatpush3.bf16.msra.mxu0 %v261_v2  ;;  %450 = vmatpush3.bf16.msra.mxu1 %v261_v2  ;;  %s166_s26 = scalar_lea.vmem %s553_s0, %s399_s23  ;;  %v402_v10 = vld [vmem:[%s555_s2] ss:$0 sm:$0xff]  ;;  %s172_s7 = scalar_lea.vmem %s556_s3, %s401_s29  ;;  %vm328_vm2 = vcmask 64512  }
   0xe   : > { %429 = vmatprep.subr.bf16.mxu0 %v466_v1  ;;  %446 = vmatprep.subr.bf16.mxu1 %v466_v1  ;;  %v470_v5 = vld [vmem:[%s166_s26] sm:$0xff]   ;;  %v471_v6 = vld [vmem:[%s166_s26 + $0x10] sm:$0xff]   ;;  %v472_v8 = vld [vmem:[%s166_s26 + $0x8] sm:$0xff]  }
   0xf   : > { %437 = vmatprep.mubr.msk.bf16.mxu0 %vm246_vm1, %v470_v5  ;;  %441 = vmatprep.mubr.msk.bf16.mxu1 %vm246_vm1, %v471_v6  ;;  %v473_v9 = vld [vmem:[%s166_s26 + $0x18] sm:$0xff]  }
  0x11   : > { %430 = vmatpush3.bf16.msra.mxu0 %v466_v1  ;;  %451 = vmatpush3.bf16.msra.mxu1 %v466_v1 }
  0x12   : > { %431 = vmatprep.subr.bf16.mxu0 %v467_v3  ;;  %447 = vmatprep.subr.bf16.mxu1 %v467_v3 }
  0x15   : > { %432 = vmatpush3.bf16.msra.mxu0 %v467_v3  ;;  %452 = vmatpush3.bf16.msra.mxu1 %v467_v3 }
  0x16   : > { %433 = vmatprep.subr.bf16.mxu0 %v468_v4  ;;  %448 = vmatprep.subr.bf16.mxu1 %v468_v4 }
  0x19   : > { %434 = vmatpush3.bf16.msra.mxu0 %v468_v4  ;;  %453 = vmatpush3.bf16.msra.mxu1 %v468_v4 }
  0x1a   : > { %435 = vmatprep.subr.bf16.mxu0 %v469_v7  ;;  %449 = vmatprep.subr.bf16.mxu1 %v469_v7 }
  0x1d   : > { %436 = vmatpush3.bf16.msra.mxu0 %v469_v7  ;;  %454 = vmatpush3.bf16.msra.mxu1 %v469_v7 }
  0x20   : > { %438 = vmatmul.mubr.msk.bf16.vlgmr.msra.gmra.mxu0 %vm246_vm1, %v472_v8  ;;  %442 = vmatmul.mubr.msk.bf16.vlgmr.msra.gmra.mxu1 %vm246_vm1, %v473_v9 }
  0xe0   : > { %v439_v11 = vpop.f32.mrf.mxu0  ;;  %v443_v12 = vpop.f32.mrf.mxu1 }
  0xe1   : > { %v306_v13 = vadd.f32 %v439_v11, %v402_v10  ;;  %v322_v14 = vadd.f32 %v443_v12, %v402_v10 }
  0xe2   : > { %v297_v15 = vpop.f32.mrf.mxu0  ;;  %v313_v16 = vpop.f32.mrf.mxu1 }
  0xe3   : > { %331 = vst.msk [vmem:[%s172_s7 + $0x10] sm:$0xff] %vm328_vm2, %v306_v13  ;;  %335 = vst.msk [vmem:[%s172_s7 + $0x30] sm:$0xff] %vm328_vm2, %v322_v14  ;;  %v298_v17 = vadd.f32 %v402_v10, %v297_v15  ;;  %v314_v18 = vadd.f32 %v402_v10, %v313_v16 }
  0xe4   : > { %v440_v19 = vpop.f32.mrf.mxu0  ;;  %v444_v20 = vpop.f32.mrf.mxu1 }
  0xe5   : > { %329 = vst.msk [vmem:[%s172_s7] sm:$0xff] %vm328_vm2, %v298_v17  ;;  %333 = vst.msk [vmem:[%s172_s7 + $0x20] sm:$0xff] %vm328_vm2, %v314_v18  ;;  %v309_v21 = vadd.f32 %v440_v19, %v402_v10  ;;  %v325_v22 = vadd.f32 %v444_v20, %v402_v10 }
  0xe6   : > { %v300_v23 = vpop.f32.mrf.mxu0  ;;  %v316_v24 = vpop.f32.mrf.mxu1 }
  0xe7   : > { %332 = vst.msk [vmem:[%s172_s7 + $0x18] sm:$0xff] %vm328_vm2, %v309_v21  ;;  %336 = vst.msk [vmem:[%s172_s7 + $0x38] sm:$0xff] %vm328_vm2, %v325_v22  ;;  %v301_v25 = vadd.f32 %v402_v10, %v300_v23  ;;  %v317_v26 = vadd.f32 %v402_v10, %v316_v24 }
  0xe9   : > { %330 = vst.msk [vmem:[%s172_s7 + $0x8] sm:$0xff] %vm328_vm2, %v301_v25  ;;  %334 = vst.msk [vmem:[%s172_s7 + $0x28] sm:$0xff] %vm328_vm2, %v317_v26 }
  0xea PF: > { %s13_s12 = sadd.s32 1, %s480_s12  }
  0xeb   : > { %p10_p4 = scmp.ge.s32.totalorder %s13_s12, 4  }
  0xed   :  { %12 = sbr.rel (!%p10_p4) target bundleno = 1 (0x1), region = 62 }

// kernel: _lambda_.7
= control target key start
LH: loop header
LB: loop body
LE: loop exit
PB: predicated region body
PF: predicated region fallthrough
CT: control target
= control target key end

     0   :  { %s609_s15 = smov 0   ;;  %s762_s0 = inlined_call_operand.vmem [shape: f32[1,8], index: 0, kind: input, shape index: {}]   ;;  %s763_s1 = inlined_call_operand.vmem [shape: f32[128,8], index: 1, kind: input, shape index: {}]   ;;  %s764_s2 = inlined_call_operand.vmem [shape: bf16[8,8], index: 2, kind: input, shape index: {}]   ;;  %s765_s3 = inlined_call_operand.vmem [shape: f32[1,8], index: 3, kind: input, shape index: {}]   ;;  %s766_s4 = inlined_call_operand.vmem [shape: f32[128,8], index: 4, kind: output, shape index: {}]  }
   0x1 LB: > { %s451_s16 = sadd.s32 4294967295, %s578_s15   ;;  %p455_p0 = scmp.ge.s32.totalorder %s578_s15, 1  ;;  %s578_s15 = sphi %s609_s15, %s14_s15  }
   0x2   : > { %p163_p1 = scmp.lt.s32.totalorder %s578_s15, 3 }
   0x4   : > { %p164_p2 = pnand %p455_p0, %p163_p1 }
   0x5   : > { %s580_s19 = smov (!%p164_p2), 127   ;;  %s581_s20 = smov (!%p164_p2), 125  }
   0x6   : > { %167 = sbr.rel (%p164_p2) target bundleno = 420 (0x1a4), region = 36  ;;  %s582_s21 = smov (!%p164_p2), 126  }
   0x7   : > { %s583_s22 = smov (!%p164_p2), 124   ;;  %s456_s25 = sshll.u32 (!%p164_p2), %s451_s16, 3 }
   0x8   : > { %p190_p3 = scmp.lt.s32.totalorder (!%p164_p2), %s456_s25, 15 }
   0xb   : > { %v202_v0 = vld [vmem:[%s762_s0] sm:$0x1]  ;;  %vm310_vm0 = vcmask 1043456   ;;  %s780_s25 = smov (!%p190_p3, %s456_s25), 15  ;;  %vm297_vm6 = vcmask 64512  }
   0xc   : > { %204 = vrot.lane.b32.xlu0 %v202_v0, %s580_s19  ;;  %486 = vpush %v202_v0  ;;  %210 = vrot.lane.b32.xlu1 %v202_v0, %s581_s20  ;;  %v289_v1 = vld [vmem:[%s764_s2] sm:$0xf]  ;;  %s457_s26 = sshll.u32 %s780_s25, 3 }
   0xd   : > { %484 = vmatprep.subr.msk.bf16.mxu0 %vm310_vm0, %v289_v1  ;;  %485 = vmatprep.subr.msk.bf16.mxu1 %vm310_vm0, %v289_v1  ;;  %v312_v2 = vsel %vm310_vm0, %v289_v1, 0  ;;  %s193_s29 = scalar_lea.vmem %s763_s1, %s457_s26  ;;  %s199_s13 = scalar_lea.vmem %s766_s4, %s457_s26 }
   0xe   : > { %473 = vmatpush3.bf16.msra.mxu0 %v312_v2  ;;  %483 = vmatpush3.bf16.msra.mxu1 %v312_v2  ;;  %v216_v7 = vld [vmem:[%s193_s29] sm:$0xff]  ;;  %v217_v8 = vld [vmem:[%s193_s29 + $0x8] sm:$0xff]  ;;  %v218_v9 = vld [vmem:[%s193_s29 + $0x10] sm:$0xff] }
   0xf   : > { %v220_v10 = vld [vmem:[%s193_s29 + $0x20] sm:$0xff]  ;;  %v219_v12 = vld [vmem:[%s193_s29 + $0x18] sm:$0xff]  ;;  %v221_v13 = vld [vmem:[%s193_s29 + $0x28] sm:$0xff] }
  0x10   : > { %207 = vrot.lane.b32.xlu0 %v202_v0, %s582_s21  ;;  %213 = vrot.lane.b32.xlu1 %v202_v0, %s583_s22  ;;  %v222_v14 = vld [vmem:[%s193_s29 + $0x30] sm:$0xff]  ;;  %v223_v15 = vld [vmem:[%s193_s29 + $0x38] sm:$0xff] }
  0x3d   : > { %s487_s30 = spop %486 }
  0x3e   : > { %v224_v11 = vstv %s487_s30 }
  0x3f   : > { %v225_v16 = vmul.f32 %v224_v11, %v216_v7  ;;  %v226_v17 = vmul.f32 %v224_v11, %v217_v8  ;;  %v229_v18 = vmul.f32 %v224_v11, %v220_v10  ;;  %v227_v19 = vmul.f32 %v224_v11, %v218_v9 }
  0x40   : > { %v228_v20 = vmul.f32 %v224_v11, %v219_v12  ;;  %v230_v21 = vmul.f32 %v224_v11, %v221_v13  ;;  %v231_v22 = vmul.f32 %v224_v11, %v222_v14  ;;  %v232_v23 = vmul.f32 %v224_v11, %v223_v15 }
  0x7e   : > { %v205_v3 = vpop.permute.xlu0 %204  ;;  %v211_v4 = vpop.permute.xlu1 %210 }
  0x7f   : > { %488 = vpush %v205_v3 }
  0x82   : > { %v208_v5 = vpop.permute.xlu0 %207  ;;  %v214_v6 = vpop.permute.xlu1 %213 }
  0x83   : > { %490 = vpush %v208_v5 }
  0x84   : > { %492 = vpush %v211_v4 }
  0x85   : > { %494 = vpush %v214_v6 }
  0xb0   : > { %s489_s5 = spop %488 }
  0xb1   : > { %v631_v24 = vstv %s489_s5 }
  0xb2   : > { %v234_v25 = vsub.f32 %v225_v16, %v631_v24  ;;  %v235_v26 = vsub.f32 %v226_v17, %v631_v24  ;;  %v238_v27 = vsub.f32 %v229_v18, %v631_v24  ;;  %v239_v28 = vsub.f32 %v230_v21, %v631_v24 }
  0xb3   : > { %v638_v29 = vsub.f32 %v227_v19, %v631_v24  ;;  %v641_v30 = vsub.f32 %v228_v20, %v631_v24  ;;  %v644_v31 = vsub.f32 %v231_v22, %v631_v24  ;;  %v647_v35 = vsub.f32 %v232_v23, %v631_v24 }
  0xb4   : > { %s491_s6 = spop %490  ;;  %v496_v32 = vand.u32 2147483647, %v234_v25  ;;  %v498_v33 = vcvt.f32.s32 %v234_v25  ;;  %v504_v34 = vand.u32 2147483647, %v235_v26  ;;  %v501_v37 = vand.u32 2147483648, %v234_v25 }
  0xb5   : > { %v649_v36 = vstv %s491_s6  ;;  %s493_s7 = spop %492  ;;  %v506_v38 = vcvt.f32.s32 %v235_v26  ;;  %v528_v39 = vand.u32 2147483647, %v238_v27  ;;  %v509_v43 = vand.u32 2147483648, %v235_v26 }
  0xb6   : > { %v651_v40 = vstv %s493_s7  ;;  %s495_s8 = spop %494  ;;  %vm653_vm1 = vcmp.lt.f32.partialorder %v496_v32, 8388608.0  ;;  %v499_v42 = vcvt.s32.f32 %v498_v33  ;;  %vm659_vm2 = vcmp.lt.f32.partialorder %v504_v34, 8388608.0 }
  0xb7   : > { %v657_v44 = vstv %s495_s8  ;;  %v507_v46 = vcvt.s32.f32 %v506_v38  ;;  %v530_v47 = vcvt.f32.s32 %v238_v27  ;;  %vm663_vm3 = vcmp.lt.f32.partialorder %v528_v39, 8388608.0 }
  0xb8   : > { %v500_v48 = vand.u32 2147483647, %v499_v42  ;;  %v536_v50 = vand.u32 2147483647, %v239_v28  ;;  %v538_v51 = vcvt.f32.s32 %v239_v28  ;;  %v533_v54 = vand.u32 2147483648, %v238_v27 }
  0xb9   : > { %v508_v52 = vand.u32 2147483647, %v507_v46  ;;  %v531_v53 = vcvt.s32.f32 %v530_v47  ;;  %v512_v55 = vand.u32 2147483647, %v638_v29  ;;  %v541_v58 = vand.u32 2147483648, %v239_v28 }
  0xba   : > { %v502_v56 = vor.u32 %v501_v37, %v500_v48  ;;  %v539_v57 = vcvt.s32.f32 %v538_v51  ;;  %v514_v59 = vcvt.f32.s32 %v638_v29  ;;  %vm669_vm4 = vcmp.lt.f32.partialorder %v536_v50, 8388608.0 }
  0xbb   : > { %v510_v60 = vor.u32 %v509_v43, %v508_v52  ;;  %v532_v61 = vand.u32 2147483647, %v531_v53  ;;  %vm673_vm5 = vcmp.lt.f32.partialorder %v512_v55, 8388608.0  ;;  %v520_v3 = vand.u32 2147483647, %v641_v30 }
  0xbc   : > { %v503_v0 = vsel %vm653_vm1, %v502_v56, %v234_v25  ;;  %v540_v1 = vand.u32 2147483647, %v539_v57  ;;  %v515_v2 = vcvt.s32.f32 %v514_v59  ;;  %v522_v7 = vcvt.f32.s32 %v641_v30 }
  0xbd   : > { %v511_v4 = vsel %vm659_vm2, %v510_v60, %v235_v26  ;;  %v251_v5 = vmax.f32 %v649_v36, %v503_v0  ;;  %v534_v6 = vor.u32 %v533_v54, %v532_v61  ;;  %v517_v11 = vand.u32 2147483648, %v638_v29 }
  0xbe   : > { %v252_v8 = vmax.f32 %v649_v36, %v511_v4  ;;  %v542_v9 = vor.u32 %v541_v58, %v540_v1  ;;  %v516_v10 = vand.u32 2147483647, %v515_v2  ;;  %vm689_vm7 = vcmp.lt.f32.partialorder %v520_v3, 8388608.0 }
  0xbf   : > { %v260_v12 = vmin.f32 %v651_v40, %v251_v5  ;;  %v535_v13 = vsel %vm663_vm3, %v534_v6, %v238_v27  ;;  %v523_v15 = vcvt.s32.f32 %v522_v7  ;;  %v525_v23 = vand.u32 2147483648, %v641_v30 }
  0xc0   : > { %v261_v16 = vmin.f32 %v651_v40, %v252_v8  ;;  %v543_v17 = vsel %vm669_vm4, %v542_v9, %v239_v28  ;;  %v255_v18 = vmax.f32 %v649_v36, %v535_v13  ;;  %v518_v19 = vor.u32 %v517_v11, %v516_v10 }
  0xc1   : > { %v268_v20 = vadd.f32 %v260_v12, %v631_v24  ;;  %v256_v21 = vmax.f32 %v649_v36, %v543_v17  ;;  %v524_v22 = vand.u32 2147483647, %v523_v15  ;;  %v546_v28 = vcvt.f32.s32 %v644_v31 }
  0xc2   : > { %v269_v25 = vadd.f32 %v261_v16, %v631_v24  ;;  %v264_v26 = vmin.f32 %v651_v40, %v255_v18  ;;  %v519_v27 = vsel %vm673_vm5, %v518_v19, %v638_v29  ;;  %v544_v41 = vand.u32 2147483647, %v644_v31 }
  0xc3   : > { %v277_v32 = vmul.f32 %v657_v44, %v268_v20  ;;  %v265_v33 = vmin.f32 %v651_v40, %v256_v21  ;;  %v526_v34 = vor.u32 %v525_v23, %v524_v22  ;;  %v253_v37 = vmax.f32 %v649_v36, %v519_v27 }
  0xc4   : > { %v278_v38 = vmul.f32 %v657_v44, %v269_v25  ;;  %v272_v39 = vadd.f32 %v264_v26, %v631_v24  ;;  %v547_v42 = vcvt.s32.f32 %v546_v28  ;;  %v549_v46 = vand.u32 2147483648, %v644_v31 }
  0xc5   : > { %v273_v43 = vadd.f32 %v265_v33, %v631_v24  ;;  %v527_v29 = vsel %vm689_vm7, %v526_v34, %v641_v30  ;;  %v262_v45 = vmin.f32 %v651_v40, %v253_v37  ;;  %v554_v53 = vcvt.f32.s32 %v647_v35 }
  0xc6   : > { %v285_v47 = vpack.c.bf16 %v278_v38, %v277_v32  ;;  %v281_v48 = vmul.f32 %v657_v44, %v272_v39  ;;  %v254_v49 = vmax.f32 %v649_v36, %v527_v29  ;;  %v548_v50 = vand.u32 2147483647, %v547_v42 }
  0xc7   : > { %v282_v51 = vmul.f32 %v657_v44, %v273_v43  ;;  %v270_v52 = vadd.f32 %v262_v45, %v631_v24  ;;  %vm545_vm8 = vcmp.lt.f32.partialorder %v544_v41, 8388608.0  ;;  %v555_v56 = vcvt.s32.f32 %v554_v53 }
  0xc8   : > { %474 = vmatprep.mubr.msk.bf16.mxu0 %vm297_vm6, %v285_v47  ;;  %v263_v30 = vmin.f32 %v651_v40, %v254_v49  ;;  %v550_v54 = vor.u32 %v549_v46, %v548_v50  ;;  %v552_v60 = vand.u32 2147483647, %v647_v35  ;;  %v557_v62 = vand.u32 2147483648, %v647_v35 }
  0xc9   : > { %v287_v55 = vpack.c.bf16 %v282_v51, %v281_v48  ;;  %v279_v58 = vmul.f32 %v657_v44, %v270_v52  ;;  %v556_v61 = vand.u32 2147483647, %v555_v56 }
  0xca   : > { %v271_v57 = vadd.f32 %v263_v30, %v631_v24  ;;  %v551_v59 = vsel %vm545_vm8, %v550_v54, %v644_v31  ;;  %vm553_vm9 = vcmp.lt.f32.partialorder %v552_v60, 8388608.0 }
  0xcb   : > { %478 = vmatprep.mubr.msk.bf16.mxu1 %vm297_vm6, %v287_v55  ;;  %v257_v63 = vmax.f32 %v649_v36, %v551_v59  ;;  %v558_v1 = vor.u32 %v557_v62, %v556_v61 }
  0xcc   : > { %v280_v0 = vmul.f32 %v657_v44, %v271_v57 }
  0xcd   : > { %v266_v2 = vmin.f32 %v651_v40, %v257_v63  ;;  %v559_v4 = vsel %vm553_vm9, %v558_v1, %v647_v35  ;;  %v460_v35 = vld [vmem:[%s765_s3] ss:$0 sm:$0xff] }
  0xce   : > { %v286_v3 = vpack.c.bf16 %v280_v0, %v279_v58  ;;  %v258_v31 = vmax.f32 %v649_v36, %v559_v4 }
  0xcf   : > { %v274_v5 = vadd.f32 %v266_v2, %v631_v24 }
  0xd0   : > { %475 = vmatmul.mubr.msk.bf16.vlgmr.msra.gmra.mxu0 %vm297_vm6, %v286_v3  ;;  %v267_v6 = vmin.f32 %v651_v40, %v258_v31 }
  0xd1   : > { %v283_v8 = vmul.f32 %v657_v44, %v274_v5 }
  0xd2   : > { %v275_v7 = vadd.f32 %v267_v6, %v631_v24 }
  0xd4   : > { %v284_v9 = vmul.f32 %v657_v44, %v275_v7 }
  0xd6   : > { %v288_v10 = vpack.c.bf16 %v284_v9, %v283_v8 }
  0xd8   : > { %479 = vmatmul.mubr.msk.bf16.vlgmr.msra.gmra.mxu1 %vm297_vm6, %v288_v10 }
 0x190   : > { %v476_v11 = vpop.f32.mrf.mxu0 }
 0x191   : > { %v357_v12 = vadd.f32 %v476_v11, %v460_v35 }
 0x192   : > { %v348_v36 = vpop.f32.mrf.mxu0 }
 0x193   : > { %v381_v24 = vmax.f32 %v357_v12, 0.0  ;;  %v349_v40 = vadd.f32 %v460_v35, %v348_v36 }
 0x194   : > { %v477_v13 = vpop.f32.mrf.mxu0 }
 0x195   : > { %389 = vst.msk [vmem:[%s199_s13 + $0x10] sm:$0xff] %vm297_vm6, %v381_v24  ;;  %v379_v44 = vmax.f32 %v349_v40, 0.0  ;;  %v360_v14 = vadd.f32 %v477_v13, %v460_v35 }
 0x196   : > { %v351_v15 = vpop.f32.mrf.mxu0 }
 0x197   : > { %387 = vst.msk [vmem:[%s199_s13] sm:$0xff] %vm297_vm6, %v379_v44  ;;  %v382_v16 = vmax.f32 %v360_v14, 0.0  ;;  %v352_v17 = vadd.f32 %v460_v35, %v351_v15 }
 0x198   : > { %v480_v19 = vpop.f32.mrf.mxu1 }
 0x199   : > { %390 = vst.msk [vmem:[%s199_s13 + $0x18] sm:$0xff] %vm297_vm6, %v382_v16  ;;  %v380_v18 = vmax.f32 %v352_v17, 0.0  ;;  %v373_v20 = vadd.f32 %v480_v19, %v460_v35 }
 0x19a   : > { %v364_v21 = vpop.f32.mrf.mxu1 }
 0x19b   : > { %388 = vst.msk [vmem:[%s199_s13 + $0x8] sm:$0xff] %vm297_vm6, %v380_v18  ;;  %v385_v22 = vmax.f32 %v373_v20, 0.0  ;;  %v365_v23 = vadd.f32 %v460_v35, %v364_v21 }
 0x19c   : > { %v481_v25 = vpop.f32.mrf.mxu1 }
 0x19d   : > { %393 = vst.msk [vmem:[%s199_s13 + $0x30] sm:$0xff] %vm297_vm6, %v385_v22  ;;  %v383_v26 = vmax.f32 %v365_v23, 0.0  ;;  %v376_v27 = vadd.f32 %v481_v25, %v460_v35 }
 0x19e   : > { %v367_v28 = vpop.f32.mrf.mxu1 }
 0x19f   : > { %391 = vst.msk [vmem:[%s199_s13 + $0x20] sm:$0xff] %vm297_vm6, %v383_v26  ;;  %v386_v32 = vmax.f32 %v376_v27, 0.0  ;;  %v368_v33 = vadd.f32 %v460_v35, %v367_v28 }
 0x1a1   : > { %394 = vst.msk [vmem:[%s199_s13 + $0x38] sm:$0xff] %vm297_vm6, %v386_v32  ;;  %v384_v34 = vmax.f32 %v368_v33, 0.0 }
 0x1a3   : > { %392 = vst.msk [vmem:[%s199_s13 + $0x28] sm:$0xff] %vm297_vm6, %v384_v34 }
 0x1a4 PF: > { %s14_s15 = sadd.s32 1, %s578_s15  }
 0x1a5   : > { %p11_p4 = scmp.ge.s32.totalorder %s14_s15, 4  }
 0x1a7   :  { %13 = sbr.rel (!%p11_p4) target bundleno = 1 (0x1), region = 66 }

</bundles_post_ra>
